<compile_context>
chip_gen: v6e
topology: v6e:2x2x1
jax: 0.10.0
libtpu: 0.0.40
codegen_flags: <defaults>
</compile_context>

<pallas_src>
from functools import partial

import numpy as np
import jax
import jax.numpy as jnp
from jax.experimental import pallas as pl
from jax.experimental.pallas import tpu as pltpu

LN_EPS = 1e-5  # PyTorch nn.LayerNorm default


# ---------------------------------------------------------------------------
# host-side constant builders (tiny: O(9 * H*W) floats, vectorized numpy)
# ---------------------------------------------------------------------------
def _tap_masks_stride1(h, w, hw_pad):
    """mask[k, 0, oh*w+ow] = 1 iff 3x3 tap k (pad=1, stride=1) reads a real pixel."""
    oh = np.arange(h)[:, None]
    ow = np.arange(w)[None, :]
    m = np.zeros((9, 1, hw_pad), np.float32)
    for ky in range(3):
        for kx in range(3):
            valid = ((oh + ky - 1 >= 0) & (oh + ky - 1 < h)
                     & (ow + kx - 1 >= 0) & (ow + kx - 1 < w))
            m[ky * 3 + kx, 0, :h * w] = valid.astype(np.float32).reshape(-1)
    return jnp.asarray(m)


def _tap_masks_stride2(h_out, w_out, h_in, w_in, hw_pad):
    """mask[k, 0, oh*w_out+ow] = 1 iff 3x3 tap k (pad=1, stride=2) reads a real pixel."""
    oh = np.arange(h_out)[:, None]
    ow = np.arange(w_out)[None, :]
    m = np.zeros((9, 1, hw_pad), np.float32)
    for ky in range(3):
        for kx in range(3):
            ih = 2 * oh + ky - 1
            iw = 2 * ow + kx - 1
            valid = (ih >= 0) & (ih < h_in) & (iw >= 0) & (iw < w_in)
            m[ky * 3 + kx, 0, :h_out * w_out] = valid.astype(np.float32).reshape(-1)
    return jnp.asarray(m)


def _fuse_weights(w, cin, cin_p, cout_p):
    """(Cout, Cin, 3, 3) -> (Cout_p, 9*Cin_p) bf16; columns tap-major, channel-minor."""
    w = jnp.asarray(w, jnp.float32)
    co = w.shape[0]
    w = jnp.transpose(w, (0, 2, 3, 1)).reshape(co, 9, cin)          # (Co, tap, Ci)
    w = jnp.pad(w, ((0, cout_p - co), (0, 0), (0, cin_p - cin)))
    return w.reshape(cout_p, 9 * cin_p).astype(jnp.bfloat16)


# ---------------------------------------------------------------------------
# kernel: one whole image per grid step, all three conv layers fused
# ---------------------------------------------------------------------------
def _down_block_kernel(xp_ref, wd_ref, bd_ref, md_ref,
                       w1_ref, b1_ref, w2_ref, b2_ref, ms_ref,
                       g1_ref, be1_ref, g2_ref, be2_ref, o_ref,
                       *, cin_p, w_out, hw_pad, inv_n):

    def shifted(v, d):
        # r[:, p] = v[:, p + d]; lane-wrapped / out-of-image positions are killed later
        # by the per-tap mask, so plain rotation is sufficient.
        s = (-d) % hw_pad
        return pltpu.roll(v, shift=s, axis=1) if s else v

    def fused_conv(srcs, m_ref, w_ref, b_ref):
        # one MXU matmul per conv: (Cout_p, 9*C) @ (9*C, HW_pad), bf16 in / f32 accum
        parts = [srcs[k] * m_ref[k] for k in range(9)]
        stack = jnp.concatenate(parts, axis=0).astype(jnp.bfloat16)
        y = jnp.dot(w_ref[...].astype(jnp.bfloat16), stack,
                    preferred_element_type=jnp.float32)
        return y + b_ref[...]

    # ---- DownBlock.down_conv (k=3, s=2, p=1) on the 4 polyphase sub-images + ReLU ----
    x = xp_ref[0]                                         # (4*cin_p, hw_pad) f32
    srcs = []
    for ky in range(3):
        rph = (ky + 1) % 2                                # 0 = even src rows, 1 = odd
        rsh = -1 if ky == 0 else 0
        for kx in range(3):
            cph = (kx + 1) % 2
            csh = -1 if kx == 0 else 0
            ph = rph * 2 + cph
            v = x[ph * cin_p:(ph + 1) * cin_p, :]         # sublane-aligned static slice
            srcs.append(shifted(v, rsh * w_out + csh))
    y = jnp.maximum(fused_conv(srcs, md_ref, wd_ref, bd_ref), 0.0)   # (cout_p, hw_pad)

    # ---- ConvBlock conv1 / conv2 (k=3, s=1, p=1) via lane rolls ----
    def conv_s1(v, w_ref, b_ref):
        s = [shifted(v, (ky - 1) * w_out + (kx - 1))
             for ky in range(3) for kx in range(3)]
        return fused_conv(s, ms_ref, w_ref, b_ref)

    lane_mask = ms_ref[4]        # centre tap mask == 1 on real pixels, 0 on lane padding

    def ln_relu(z, g_ref, b_ref):
        # single-pass LayerNorm over the real (Cout, H, W) entries; padded lanes/channels
        # are zero and excluded via inv_n = 1 / (Cout*H*W).  Fused affine + ReLU.
        z = z * lane_mask
        mean = jnp.sum(z) * inv_n
        var = jnp.sum(z * z) * inv_n - mean * mean
        s = jax.lax.rsqrt(var + LN_EPS)
        return jnp.maximum((z - mean) * s * g_ref[...] + b_ref[...], 0.0)

    y = ln_relu(conv_s1(y, w1_ref, b1_ref), g1_ref, be1_ref)
    y = ln_relu(conv_s1(y, w2_ref, b2_ref), g2_ref, be2_ref)
    o_ref[0] = y.astype(o_ref.dtype)


# ---------------------------------------------------------------------------
# wrapper
# ---------------------------------------------------------------------------
@jax.jit
def down_block_forward(x, params):
    """Mirror of DownBlock.forward.

    x      : (B, Cin, Hin, Win) float32
    params : PyTorch-layout weights (see __main__)
    returns: (B, Cout, Hout, Wout) with Hout = (Hin-1)//2 + 1 (k=3, s=2, p=1)
    """
    x = jnp.asarray(x, jnp.float32)
    B, Cin, Hin, Win = x.shape
    Cout = params["down_w"].shape[0]

    He, We = Hin + (Hin % 2), Win + (Win % 2)      # evenize (extra zero row/col == pad)
    Hout, Wout = He // 2, We // 2
    HW = Hout * Wout
    HW_pad = ((HW + 127) // 128) * 128             # lane-dense activations / output
    Cin_p = ((Cin + 7) // 8) * 8                   # sublane-aligned channel blocks
    Cout_p = ((Cout + 7) // 8) * 8

    # polyphase split: the stride-2 conv becomes 9 uniform-shift taps on 4 sub-images
    if (He, We) != (Hin, Win):
        x = jnp.pad(x, ((0, 0), (0, 0), (0, He - Hin), (0, We - Win)))
    xp = jnp.stack([x[:, :, rp::2, cp::2] for rp in (0, 1) for cp in (0, 1)], axis=1)
    xp = jnp.pad(xp, ((0, 0), (0, 0), (0, Cin_p - Cin), (0, 0), (0, 0)))
    xp = xp.reshape(B, 4 * Cin_p, HW)
    xp = jnp.pad(xp, ((0, 0), (0, 0), (0, HW_pad - HW)))

    # constants (small; kept resident across grid steps via constant index maps)
    wd = _fuse_weights(params["down_w"], Cin, Cin_p, Cout_p)
    w1 = _fuse_weights(params["conv1_w"], Cout, Cout_p, Cout_p)
    w2 = _fuse_weights(params["conv2_w"], Cout, Cout_p, Cout_p)

    def col(b):
        b = jnp.asarray(b, jnp.float32)
        return jnp.pad(b, (0, Cout_p - Cout)).reshape(Cout_p, 1)

    def ln_param(p):
        p = jnp.asarray(p, jnp.float32).reshape(Cout, HW)
        return jnp.pad(p, ((0, Cout_p - Cout), (0, HW_pad - HW)))

    bd, b1, b2 = col(params["down_b"]), col(params["conv1_b"]), col(params["conv2_b"])
    g1, be1 = ln_param(params["ln1_w"]), ln_param(params["ln1_b"])
    g2, be2 = ln_param(params["ln2_w"]), ln_param(params["ln2_b"])
    md = _tap_masks_stride2(Hout, Wout, He, We, HW_pad)
    ms = _tap_masks_stride1(Hout, Wout, HW_pad)

    consts = (wd, bd, md, w1, b1, w2, b2, ms, g1, be1, g2, be2)

    kernel = partial(_down_block_kernel, cin_p=Cin_p, w_out=Wout, hw_pad=HW_pad,
                     inv_n=1.0 / float(Cout * HW))

    def full(a):  # whole-array block, constant index -> resident across grid steps
        return pl.BlockSpec(a.shape, lambda b, _n=a.ndim: (0,) * _n)

    # explicit scoped-VMEM budget (v5e default is only 16 MiB): streamed blocks +
    # resident constants (x2 double-buffering) + in-kernel tap-stack temporaries.
    stream = (4 * Cin_p + 2 * Cout_p) * HW_pad * 4
    resident = sum(int(np.prod(a.shape)) * a.dtype.itemsize for a in consts)
    temps = 9 * max(Cin_p, Cout_p) * HW_pad * 6 + 8 * Cout_p * HW_pad * 4
    vmem_limit = int(min(64 << 20, max(32 << 20, 2 * (stream + resident) + temps + (4 << 20))))

    out = pl.pallas_call(
        kernel,
        out_shape=jax.ShapeDtypeStruct((B, Cout_p, HW_pad), jnp.float32),
        grid=(B,),
        in_specs=[pl.BlockSpec((1, 4 * Cin_p, HW_pad), lambda b: (b, 0, 0))]
                 + [full(a) for a in consts],
        out_specs=pl.BlockSpec((1, Cout_p, HW_pad), lambda b: (b, 0, 0)),
        compiler_params=pltpu.CompilerParams(
            dimension_semantics=("parallel",),
            vmem_limit_bytes=vmem_limit),
    )(xp, *consts)

    return out[:, :Cout, :HW].reshape(B, Cout, Hout, Wout)


# ---------------------------------------------------------------------------
# pure-jnp reference (transcription of the PyTorch forward) + test
# ---------------------------------------------------------------------------
def _reference_forward(x, params):
    def conv(v, w, b, stride):
        y = jax.lax.conv_general_dilated(
            v, jnp.asarray(w, jnp.float32), window_strides=(stride, stride),
            padding=((1, 1), (1, 1)), dimension_numbers=("NCHW", "OIHW", "NCHW"))
        return y + jnp.asarray(b, jnp.float32)[None, :, None, None]

    def ln(v, g, b):
        mean = jnp.mean(v, axis=(1, 2, 3), keepdims=True)
        var = jnp.mean((v - mean) ** 2, axis=(1, 2, 3), keepdims=True)
        return (v - mean) / jnp.sqrt(var + LN_EPS) * g[None] + b[None]

    y = jax.nn.relu(conv(x, params["down_w"], params["down_b"], 2))
    y = jax.nn.relu(ln(conv(y, params["conv1_w"], params["conv1_b"], 1),
                       params["ln1_w"], params["ln1_b"]))
    y = jax.nn.relu(ln(conv(y, params["conv2_w"], params["conv2_b"], 1),
                       params["ln2_w"], params["ln2_b"]))
    return y


if __name__ == "__main__":
    key = jax.random.PRNGKey(0)
    B, Cin, Cout, Hin, Win = 2, 4, 8, 16, 16
    Hout, Wout = Hin // 2, Win // 2

    ks = jax.random.split(key, 11)
    params = {
        "down_w": 0.1 * jax.random.normal(ks[0], (Cout, Cin, 3, 3), jnp.float32),
        "down_b": 0.1 * jax.random.normal(ks[1], (Cout,), jnp.float32),
        "conv1_w": 0.1 * jax.random.normal(ks[2], (Cout, Cout, 3, 3), jnp.float32),
        "conv1_b": 0.1 * jax.random.normal(ks[3], (Cout,), jnp.float32),
        "conv2_w": 0.1 * jax.random.normal(ks[4], (Cout, Cout, 3, 3), jnp.float32),
        "conv2_b": 0.1 * jax.random.normal(ks[5], (Cout,), jnp.float32),
        "ln1_w": 1.0 + 0.1 * jax.random.normal(ks[6], (Cout, Hout, Wout), jnp.float32),
        "ln1_b": 0.1 * jax.random.normal(ks[7], (Cout, Hout, Wout), jnp.float32),
        "ln2_w": 1.0 + 0.1 * jax.random.normal(ks[8], (Cout, Hout, Wout), jnp.float32),
        "ln2_b": 0.1 * jax.random.normal(ks[9], (Cout, Hout, Wout), jnp.float32),
    }
    x = jax.random.normal(ks[10], (B, Cin, Hin, Win), jnp.float32)

    y = jax.block_until_ready(down_block_forward(x, params))
    ref = _reference_forward(x, params)

    assert y.shape == (B, Cout, Hout, Wout), y.shape
    err = float(jnp.max(jnp.abs(y - ref)))
    # bf16 MXU operands with f32 accumulation -> tolerance set accordingly
    assert jnp.allclose(y, ref, rtol=5e-2, atol=5e-2), f"max abs err {err}"

    print("KERNEL_OK")
</pallas_src>

<mosaic_0001>
module attributes {stable_mosaic.version = 11 : i64} {
  func.func @_down_block_kernel(%arg0: i32, %arg1: memref<1x32x128xf32, #tpu.memory_space<vmem>>, %arg2: memref<8x72xbf16, #tpu.memory_space<vmem>>, %arg3: memref<8x1xf32, #tpu.memory_space<vmem>>, %arg4: memref<9x1x128xf32, #tpu.memory_space<vmem>>, %arg5: memref<8x72xbf16, #tpu.memory_space<vmem>>, %arg6: memref<8x1xf32, #tpu.memory_space<vmem>>, %arg7: memref<8x72xbf16, #tpu.memory_space<vmem>>, %arg8: memref<8x1xf32, #tpu.memory_space<vmem>>, %arg9: memref<9x1x128xf32, #tpu.memory_space<vmem>>, %arg10: memref<8x128xf32, #tpu.memory_space<vmem>>, %arg11: memref<8x128xf32, #tpu.memory_space<vmem>>, %arg12: memref<8x128xf32, #tpu.memory_space<vmem>>, %arg13: memref<8x128xf32, #tpu.memory_space<vmem>>, %arg14: memref<1x8x128xf32, #tpu.memory_space<vmem>>) attributes {dimension_semantics = [#tpu.dimension_semantics<parallel>], iteration_bounds = array<i64: 2>, scalar_prefetch = 0 : i64, scratch_operands = 0 : i64, tpu.core_type = #tpu.core_type<tc>, window_params = [{transform_indices = @transform_0, window_bounds = array<i64: 1, 32, 128>}, {pipeline_mode = #tpu.pipeline_mode<synchronous>, transform_indices = @transform_1, window_bounds = array<i64: 8, 72>}, {pipeline_mode = #tpu.pipeline_mode<synchronous>, transform_indices = @transform_2, window_bounds = array<i64: 8, 1>}, {pipeline_mode = #tpu.pipeline_mode<synchronous>, transform_indices = @transform_3, window_bounds = array<i64: 9, 1, 128>}, {pipeline_mode = #tpu.pipeline_mode<synchronous>, transform_indices = @transform_4, window_bounds = array<i64: 8, 72>}, {pipeline_mode = #tpu.pipeline_mode<synchronous>, transform_indices = @transform_5, window_bounds = array<i64: 8, 1>}, {pipeline_mode = #tpu.pipeline_mode<synchronous>, transform_indices = @transform_6, window_bounds = array<i64: 8, 72>}, {pipeline_mode = #tpu.pipeline_mode<synchronous>, transform_indices = @transform_7, window_bounds = array<i64: 8, 1>}, {pipeline_mode = #tpu.pipeline_mode<synchronous>, transform_indices = @transform_8, window_bounds = array<i64: 9, 1, 128>}, {pipeline_mode = #tpu.pipeline_mode<synchronous>, transform_indices = @transform_9, window_bounds = array<i64: 8, 128>}, {pipeline_mode = #tpu.pipeline_mode<synchronous>, transform_indices = @transform_10, window_bounds = array<i64: 8, 128>}, {pipeline_mode = #tpu.pipeline_mode<synchronous>, transform_indices = @transform_11, window_bounds = array<i64: 8, 128>}, {pipeline_mode = #tpu.pipeline_mode<synchronous>, transform_indices = @transform_12, window_bounds = array<i64: 8, 128>}, {transform_indices = @transform_13, window_bounds = array<i64: 1, 8, 128>}]} {
    %c0 = arith.constant 0 : index
    %c0_0 = arith.constant 0 : index
    %c0_1 = arith.constant 0 : index
    %0 = vector.load %arg1[%c0, %c0_0, %c0_1] : memref<1x32x128xf32, #tpu.memory_space<vmem>>, vector<1x32x128xf32>
    %1 = vector.shape_cast %0 : vector<1x32x128xf32> to vector<32x128xf32>
    %2 = vector.extract_strided_slice %1 {offsets = [24, 0], sizes = [8, 128], strides = [1, 1]} : vector<32x128xf32> to vector<8x128xf32>
    %c9_i32 = arith.constant 9 : i32
    %3 = tpu.dynamic_rotate %2 by %c9_i32 dim 1 : vector<8x128xf32>, i32 -> vector<8x128xf32>
    %4 = vector.extract_strided_slice %1 {offsets = [16, 0], sizes = [8, 128], strides = [1, 1]} : vector<32x128xf32> to vector<8x128xf32>
    %c8_i32 = arith.constant 8 : i32
    %5 = tpu.dynamic_rotate %4 by %c8_i32 dim 1 : vector<8x128xf32>, i32 -> vector<8x128xf32>
    %6 = vector.extract_strided_slice %1 {offsets = [24, 0], sizes = [8, 128], strides = [1, 1]} : vector<32x128xf32> to vector<8x128xf32>
    %c8_i32_2 = arith.constant 8 : i32
    %7 = tpu.dynamic_rotate %6 by %c8_i32_2 dim 1 : vector<8x128xf32>, i32 -> vector<8x128xf32>
    %8 = vector.extract_strided_slice %1 {offsets = [8, 0], sizes = [8, 128], strides = [1, 1]} : vector<32x128xf32> to vector<8x128xf32>
    %c1_i32 = arith.constant 1 : i32
    %9 = tpu.dynamic_rotate %8 by %c1_i32 dim 1 : vector<8x128xf32>, i32 -> vector<8x128xf32>
    %10 = vector.extract_strided_slice %1 {offsets = [0, 0], sizes = [8, 128], strides = [1, 1]} : vector<32x128xf32> to vector<8x128xf32>
    %11 = vector.extract_strided_slice %1 {offsets = [8, 0], sizes = [8, 128], strides = [1, 1]} : vector<32x128xf32> to vector<8x128xf32>
    %12 = vector.extract_strided_slice %1 {offsets = [24, 0], sizes = [8, 128], strides = [1, 1]} : vector<32x128xf32> to vector<8x128xf32>
    %c1_i32_3 = arith.constant 1 : i32
    %13 = tpu.dynamic_rotate %12 by %c1_i32_3 dim 1 : vector<8x128xf32>, i32 -> vector<8x128xf32>
    %14 = vector.extract_strided_slice %1 {offsets = [16, 0], sizes = [8, 128], strides = [1, 1]} : vector<32x128xf32> to vector<8x128xf32>
    %15 = vector.extract_strided_slice %1 {offsets = [24, 0], sizes = [8, 128], strides = [1, 1]} : vector<32x128xf32> to vector<8x128xf32>
    %c0_4 = arith.constant 0 : index
    %c0_5 = arith.constant 0 : index
    %c0_6 = arith.constant 0 : index
    %16 = vector.load %arg4[%c0_4, %c0_5, %c0_6] : memref<9x1x128xf32, #tpu.memory_space<vmem>>, vector<1x1x128xf32>
    %17 = vector.shape_cast %16 : vector<1x1x128xf32> to vector<1x128xf32>
    %18 = vector.broadcast %17 : vector<1x128xf32> to vector<8x128xf32>
    %19 = arith.mulf %3, %18 : vector<8x128xf32>
    %c1 = arith.constant 1 : index
    %c0_7 = arith.constant 0 : index
    %c0_8 = arith.constant 0 : index
    %20 = vector.load %arg4[%c1, %c0_7, %c0_8] : memref<9x1x128xf32, #tpu.memory_space<vmem>>, vector<1x1x128xf32>
    %21 = vector.shape_cast %20 : vector<1x1x128xf32> to vector<1x128xf32>
    %22 = vector.broadcast %21 : vector<1x128xf32> to vector<8x128xf32>
    %23 = arith.mulf %5, %22 : vector<8x128xf32>
    %c2 = arith.constant 2 : index
    %c0_9 = arith.constant 0 : index
    %c0_10 = arith.constant 0 : index
    %24 = vector.load %arg4[%c2, %c0_9, %c0_10] : memref<9x1x128xf32, #tpu.memory_space<vmem>>, vector<1x1x128xf32>
    %25 = vector.shape_cast %24 : vector<1x1x128xf32> to vector<1x128xf32>
    %26 = vector.broadcast %25 : vector<1x128xf32> to vector<8x128xf32>
    %27 = arith.mulf %7, %26 : vector<8x128xf32>
    %c3 = arith.constant 3 : index
    %c0_11 = arith.constant 0 : index
    %c0_12 = arith.constant 0 : index
    %28 = vector.load %arg4[%c3, %c0_11, %c0_12] : memref<9x1x128xf32, #tpu.memory_space<vmem>>, vector<1x1x128xf32>
    %29 = vector.shape_cast %28 : vector<1x1x128xf32> to vector<1x128xf32>
    %30 = vector.broadcast %29 : vector<1x128xf32> to vector<8x128xf32>
    %31 = arith.mulf %9, %30 : vector<8x128xf32>
    %c4 = arith.constant 4 : index
    %c0_13 = arith.constant 0 : index
    %c0_14 = arith.constant 0 : index
    %32 = vector.load %arg4[%c4, %c0_13, %c0_14] : memref<9x1x128xf32, #tpu.memory_space<vmem>>, vector<1x1x128xf32>
    %33 = vector.shape_cast %32 : vector<1x1x128xf32> to vector<1x128xf32>
    %34 = vector.broadcast %33 : vector<1x128xf32> to vector<8x128xf32>
    %35 = arith.mulf %10, %34 : vector<8x128xf32>
    %c5 = arith.constant 5 : index
    %c0_15 = arith.constant 0 : index
    %c0_16 = arith.constant 0 : index
    %36 = vector.load %arg4[%c5, %c0_15, %c0_16] : memref<9x1x128xf32, #tpu.memory_space<vmem>>, vector<1x1x128xf32>
    %37 = vector.shape_cast %36 : vector<1x1x128xf32> to vector<1x128xf32>
    %38 = vector.broadcast %37 : vector<1x128xf32> to vector<8x128xf32>
    %39 = arith.mulf %11, %38 : vector<8x128xf32>
    %c6 = arith.constant 6 : index
    %c0_17 = arith.constant 0 : index
    %c0_18 = arith.constant 0 : index
    %40 = vector.load %arg4[%c6, %c0_17, %c0_18] : memref<9x1x128xf32, #tpu.memory_space<vmem>>, vector<1x1x128xf32>
    %41 = vector.shape_cast %40 : vector<1x1x128xf32> to vector<1x128xf32>
    %42 = vector.broadcast %41 : vector<1x128xf32> to vector<8x128xf32>
    %43 = arith.mulf %13, %42 : vector<8x128xf32>
    %c7 = arith.constant 7 : index
    %c0_19 = arith.constant 0 : index
    %c0_20 = arith.constant 0 : index
    %44 = vector.load %arg4[%c7, %c0_19, %c0_20] : memref<9x1x128xf32, #tpu.memory_space<vmem>>, vector<1x1x128xf32>
    %45 = vector.shape_cast %44 : vector<1x1x128xf32> to vector<1x128xf32>
    %46 = vector.broadcast %45 : vector<1x128xf32> to vector<8x128xf32>
    %47 = arith.mulf %14, %46 : vector<8x128xf32>
    %c8 = arith.constant 8 : index
    %c0_21 = arith.constant 0 : index
    %c0_22 = arith.constant 0 : index
    %48 = vector.load %arg4[%c8, %c0_21, %c0_22] : memref<9x1x128xf32, #tpu.memory_space<vmem>>, vector<1x1x128xf32>
    %49 = vector.shape_cast %48 : vector<1x1x128xf32> to vector<1x128xf32>
    %50 = vector.broadcast %49 : vector<1x128xf32> to vector<8x128xf32>
    %51 = arith.mulf %15, %50 : vector<8x128xf32>
    %52 = tpu.concatenate %19, %23, %27, %31, %35, %39, %43, %47, %51 in 0 : vector<8x128xf32>, vector<8x128xf32>, vector<8x128xf32>, vector<8x128xf32>, vector<8x128xf32>, vector<8x128xf32>, vector<8x128xf32>, vector<8x128xf32>, vector<8x128xf32> -> vector<72x128xf32>
    %53 = arith.truncf %52 : vector<72x128xf32> to vector<72x128xbf16>
    %c0_23 = arith.constant 0 : index
    %c0_24 = arith.constant 0 : index
    %54 = vector.load %arg2[%c0_23, %c0_24] : memref<8x72xbf16, #tpu.memory_space<vmem>>, vector<8x72xbf16>
    %cst = arith.constant dense<0.000000e+00> : vector<8x128xf32>
    %55 = tpu.matmul %54, %53, %cst {dimension_numbers = #tpu.dot_dimension_numbers<[1], [0], [0], [1], [0, 0, 1, 1], [], []>} : vector<8x72xbf16>, vector<72x128xbf16>, vector<8x128xf32> -> vector<8x128xf32>
    %c0_25 = arith.constant 0 : index
    %c0_26 = arith.constant 0 : index
    %56 = vector.load %arg3[%c0_25, %c0_26] : memref<8x1xf32, #tpu.memory_space<vmem>>, vector<8x1xf32>
    %57 = vector.broadcast %56 : vector<8x1xf32> to vector<8x128xf32>
    %58 = arith.addf %55, %57 : vector<8x128xf32>
    %cst_27 = arith.constant 0.000000e+00 : f32
    %59 = vector.broadcast %cst_27 : f32 to vector<8x128xf32>
    %60 = arith.maximumf %58, %59 : vector<8x128xf32>
    %c4_28 = arith.constant 4 : index
    %c0_29 = arith.constant 0 : index
    %c0_30 = arith.constant 0 : index
    %61 = vector.load %arg9[%c4_28, %c0_29, %c0_30] : memref<9x1x128xf32, #tpu.memory_space<vmem>>, vector<1x1x128xf32>
    %62 = vector.shape_cast %61 : vector<1x1x128xf32> to vector<1x128xf32>
    %c9_i32_31 = arith.constant 9 : i32
    %63 = tpu.dynamic_rotate %60 by %c9_i32_31 dim 1 : vector<8x128xf32>, i32 -> vector<8x128xf32>
    %c8_i32_32 = arith.constant 8 : i32
    %64 = tpu.dynamic_rotate %60 by %c8_i32_32 dim 1 : vector<8x128xf32>, i32 -> vector<8x128xf32>
    %c7_i32 = arith.constant 7 : i32
    %65 = tpu.dynamic_rotate %60 by %c7_i32 dim 1 : vector<8x128xf32>, i32 -> vector<8x128xf32>
    %c1_i32_33 = arith.constant 1 : i32
    %66 = tpu.dynamic_rotate %60 by %c1_i32_33 dim 1 : vector<8x128xf32>, i32 -> vector<8x128xf32>
    %c127_i32 = arith.constant 127 : i32
    %67 = tpu.dynamic_rotate %60 by %c127_i32 dim 1 : vector<8x128xf32>, i32 -> vector<8x128xf32>
    %c121_i32 = arith.constant 121 : i32
    %68 = tpu.dynamic_rotate %60 by %c121_i32 dim 1 : vector<8x128xf32>, i32 -> vector<8x128xf32>
    %c120_i32 = arith.constant 120 : i32
    %69 = tpu.dynamic_rotate %60 by %c120_i32 dim 1 : vector<8x128xf32>, i32 -> vector<8x128xf32>
    %c119_i32 = arith.constant 119 : i32
    %70 = tpu.dynamic_rotate %60 by %c119_i32 dim 1 : vector<8x128xf32>, i32 -> vector<8x128xf32>
    %c0_34 = arith.constant 0 : index
    %c0_35 = arith.constant 0 : index
    %c0_36 = arith.constant 0 : index
    %71 = vector.load %arg9[%c0_34, %c0_35, %c0_36] : memref<9x1x128xf32, #tpu.memory_space<vmem>>, vector<1x1x128xf32>
    %72 = vector.shape_cast %71 : vector<1x1x128xf32> to vector<1x128xf32>
    %73 = vector.broadcast %72 : vector<1x128xf32> to vector<8x128xf32>
    %74 = arith.mulf %63, %73 : vector<8x128xf32>
    %c1_37 = arith.constant 1 : index
    %c0_38 = arith.constant 0 : index
    %c0_39 = arith.constant 0 : index
    %75 = vector.load %arg9[%c1_37, %c0_38, %c0_39] : memref<9x1x128xf32, #tpu.memory_space<vmem>>, vector<1x1x128xf32>
    %76 = vector.shape_cast %75 : vector<1x1x128xf32> to vector<1x128xf32>
    %77 = vector.broadcast %76 : vector<1x128xf32> to vector<8x128xf32>
    %78 = arith.mulf %64, %77 : vector<8x128xf32>
    %c2_40 = arith.constant 2 : index
    %c0_41 = arith.constant 0 : index
    %c0_42 = arith.constant 0 : index
    %79 = vector.load %arg9[%c2_40, %c0_41, %c0_42] : memref<9x1x128xf32, #tpu.memory_space<vmem>>, vector<1x1x128xf32>
    %80 = vector.shape_cast %79 : vector<1x1x128xf32> to vector<1x128xf32>
    %81 = vector.broadcast %80 : vector<1x128xf32> to vector<8x128xf32>
    %82 = arith.mulf %65, %81 : vector<8x128xf32>
    %c3_43 = arith.constant 3 : index
    %c0_44 = arith.constant 0 : index
    %c0_45 = arith.constant 0 : index
    %83 = vector.load %arg9[%c3_43, %c0_44, %c0_45] : memref<9x1x128xf32, #tpu.memory_space<vmem>>, vector<1x1x128xf32>
    %84 = vector.shape_cast %83 : vector<1x1x128xf32> to vector<1x128xf32>
    %85 = vector.broadcast %84 : vector<1x128xf32> to vector<8x128xf32>
    %86 = arith.mulf %66, %85 : vector<8x128xf32>
    %c4_46 = arith.constant 4 : index
    %c0_47 = arith.constant 0 : index
    %c0_48 = arith.constant 0 : index
    %87 = vector.load %arg9[%c4_46, %c0_47, %c0_48] : memref<9x1x128xf32, #tpu.memory_space<vmem>>, vector<1x1x128xf32>
    %88 = vector.shape_cast %87 : vector<1x1x128xf32> to vector<1x128xf32>
    %89 = vector.broadcast %88 : vector<1x128xf32> to vector<8x128xf32>
    %90 = arith.mulf %60, %89 : vector<8x128xf32>
    %c5_49 = arith.constant 5 : index
    %c0_50 = arith.constant 0 : index
    %c0_51 = arith.constant 0 : index
    %91 = vector.load %arg9[%c5_49, %c0_50, %c0_51] : memref<9x1x128xf32, #tpu.memory_space<vmem>>, vector<1x1x128xf32>
    %92 = vector.shape_cast %91 : vector<1x1x128xf32> to vector<1x128xf32>
    %93 = vector.broadcast %92 : vector<1x128xf32> to vector<8x128xf32>
    %94 = arith.mulf %67, %93 : vector<8x128xf32>
    %c6_52 = arith.constant 6 : index
    %c0_53 = arith.constant 0 : index
    %c0_54 = arith.constant 0 : index
    %95 = vector.load %arg9[%c6_52, %c0_53, %c0_54] : memref<9x1x128xf32, #tpu.memory_space<vmem>>, vector<1x1x128xf32>
    %96 = vector.shape_cast %95 : vector<1x1x128xf32> to vector<1x128xf32>
    %97 = vector.broadcast %96 : vector<1x128xf32> to vector<8x128xf32>
    %98 = arith.mulf %68, %97 : vector<8x128xf32>
    %c7_55 = arith.constant 7 : index
    %c0_56 = arith.constant 0 : index
    %c0_57 = arith.constant 0 : index
    %99 = vector.load %arg9[%c7_55, %c0_56, %c0_57] : memref<9x1x128xf32, #tpu.memory_space<vmem>>, vector<1x1x128xf32>
    %100 = vector.shape_cast %99 : vector<1x1x128xf32> to vector<1x128xf32>
    %101 = vector.broadcast %100 : vector<1x128xf32> to vector<8x128xf32>
    %102 = arith.mulf %69, %101 : vector<8x128xf32>
    %c8_58 = arith.constant 8 : index
    %c0_59 = arith.constant 0 : index
    %c0_60 = arith.constant 0 : index
    %103 = vector.load %arg9[%c8_58, %c0_59, %c0_60] : memref<9x1x128xf32, #tpu.memory_space<vmem>>, vector<1x1x128xf32>
    %104 = vector.shape_cast %103 : vector<1x1x128xf32> to vector<1x128xf32>
    %105 = vector.broadcast %104 : vector<1x128xf32> to vector<8x128xf32>
    %106 = arith.mulf %70, %105 : vector<8x128xf32>
    %107 = tpu.concatenate %74, %78, %82, %86, %90, %94, %98, %102, %106 in 0 : vector<8x128xf32>, vector<8x128xf32>, vector<8x128xf32>, vector<8x128xf32>, vector<8x128xf32>, vector<8x128xf32>, vector<8x128xf32>, vector<8x128xf32>, vector<8x128xf32> -> vector<72x128xf32>
    %108 = arith.truncf %107 : vector<72x128xf32> to vector<72x128xbf16>
    %c0_61 = arith.constant 0 : index
    %c0_62 = arith.constant 0 : index
    %109 = vector.load %arg5[%c0_61, %c0_62] : memref<8x72xbf16, #tpu.memory_space<vmem>>, vector<8x72xbf16>
    %cst_63 = arith.constant dense<0.000000e+00> : vector<8x128xf32>
    %110 = tpu.matmul %109, %108, %cst_63 {dimension_numbers = #tpu.dot_dimension_numbers<[1], [0], [0], [1], [0, 0, 1, 1], [], []>} : vector<8x72xbf16>, vector<72x128xbf16>, vector<8x128xf32> -> vector<8x128xf32>
    %c0_64 = arith.constant 0 : index
    %c0_65 = arith.constant 0 : index
    %111 = vector.load %arg6[%c0_64, %c0_65] : memref<8x1xf32, #tpu.memory_space<vmem>>, vector<8x1xf32>
    %112 = vector.broadcast %111 : vector<8x1xf32> to vector<8x128xf32>
    %113 = arith.addf %110, %112 : vector<8x128xf32>
    %114 = vector.broadcast %62 : vector<1x128xf32> to vector<8x128xf32>
    %115 = arith.mulf %113, %114 : vector<8x128xf32>
    %116 = vector.shape_cast %115 : vector<8x128xf32> to vector<1x8x128xf32>
    %cst_66 = arith.constant dense<0.000000e+00> : vector<1xf32>
    %117 = vector.multi_reduction <add>, %116, %cst_66 [1, 2] : vector<1x8x128xf32> to vector<1xf32>
    %118 = vector.shape_cast %117 : vector<1xf32> to vector<1x1x1xf32>
    %119 = vector.extract %118[0, 0, 0] : f32 from vector<1x1x1xf32>
    %cst_67 = arith.constant 0.001953125 : f32
    %120 = arith.mulf %119, %cst_67 : f32
    %121 = arith.mulf %115, %115 : vector<8x128xf32>
    %122 = vector.shape_cast %121 : vector<8x128xf32> to vector<1x8x128xf32>
    %cst_68 = arith.constant dense<0.000000e+00> : vector<1xf32>
    %123 = vector.multi_reduction <add>, %122, %cst_68 [1, 2] : vector<1x8x128xf32> to vector<1xf32>
    %124 = vector.shape_cast %123 : vector<1xf32> to vector<1x1x1xf32>
    %125 = vector.extract %124[0, 0, 0] : f32 from vector<1x1x1xf32>
    %cst_69 = arith.constant 0.001953125 : f32
    %126 = arith.mulf %125, %cst_69 : f32
    %127 = arith.mulf %120, %120 : f32
    %128 = arith.subf %126, %127 : f32
    %cst_70 = arith.constant 9.99999974E-6 : f32
    %129 = arith.addf %128, %cst_70 : f32
    %130 = math.rsqrt %129 : f32
    %131 = vector.broadcast %120 : f32 to vector<8x128xf32>
    %132 = arith.subf %115, %131 : vector<8x128xf32>
    %133 = vector.broadcast %130 : f32 to vector<8x128xf32>
    %134 = arith.mulf %132, %133 : vector<8x128xf32>
    %c0_71 = arith.constant 0 : index
    %c0_72 = arith.constant 0 : index
    %135 = vector.load %arg10[%c0_71, %c0_72] : memref<8x128xf32, #tpu.memory_space<vmem>>, vector<8x128xf32>
    %136 = arith.mulf %134, %135 : vector<8x128xf32>
    %c0_73 = arith.constant 0 : index
    %c0_74 = arith.constant 0 : index
    %137 = vector.load %arg11[%c0_73, %c0_74] : memref<8x128xf32, #tpu.memory_space<vmem>>, vector<8x128xf32>
    %138 = arith.addf %136, %137 : vector<8x128xf32>
    %cst_75 = arith.constant 0.000000e+00 : f32
    %139 = vector.broadcast %cst_75 : f32 to vector<8x128xf32>
    %140 = arith.maximumf %138, %139 : vector<8x128xf32>
    %c9_i32_76 = arith.constant 9 : i32
    %141 = tpu.dynamic_rotate %140 by %c9_i32_76 dim 1 : vector<8x128xf32>, i32 -> vector<8x128xf32>
    %c8_i32_77 = arith.constant 8 : i32
    %142 = tpu.dynamic_rotate %140 by %c8_i32_77 dim 1 : vector<8x128xf32>, i32 -> vector<8x128xf32>
    %c7_i32_78 = arith.constant 7 : i32
    %143 = tpu.dynamic_rotate %140 by %c7_i32_78 dim 1 : vector<8x128xf32>, i32 -> vector<8x128xf32>
    %c1_i32_79 = arith.constant 1 : i32
    %144 = tpu.dynamic_rotate %140 by %c1_i32_79 dim 1 : vector<8x128xf32>, i32 -> vector<8x128xf32>
    %c127_i32_80 = arith.constant 127 : i32
    %145 = tpu.dynamic_rotate %140 by %c127_i32_80 dim 1 : vector<8x128xf32>, i32 -> vector<8x128xf32>
    %c121_i32_81 = arith.constant 121 : i32
    %146 = tpu.dynamic_rotate %140 by %c121_i32_81 dim 1 : vector<8x128xf32>, i32 -> vector<8x128xf32>
    %c120_i32_82 = arith.constant 120 : i32
    %147 = tpu.dynamic_rotate %140 by %c120_i32_82 dim 1 : vector<8x128xf32>, i32 -> vector<8x128xf32>
    %c119_i32_83 = arith.constant 119 : i32
    %148 = tpu.dynamic_rotate %140 by %c119_i32_83 dim 1 : vector<8x128xf32>, i32 -> vector<8x128xf32>
    %c0_84 = arith.constant 0 : index
    %c0_85 = arith.constant 0 : index
    %c0_86 = arith.constant 0 : index
    %149 = vector.load %arg9[%c0_84, %c0_85, %c0_86] : memref<9x1x128xf32, #tpu.memory_space<vmem>>, vector<1x1x128xf32>
    %150 = vector.shape_cast %149 : vector<1x1x128xf32> to vector<1x128xf32>
    %151 = vector.broadcast %150 : vector<1x128xf32> to vector<8x128xf32>
    %152 = arith.mulf %141, %151 : vector<8x128xf32>
    %c1_87 = arith.constant 1 : index
    %c0_88 = arith.constant 0 : index
    %c0_89 = arith.constant 0 : index
    %153 = vector.load %arg9[%c1_87, %c0_88, %c0_89] : memref<9x1x128xf32, #tpu.memory_space<vmem>>, vector<1x1x128xf32>
    %154 = vector.shape_cast %153 : vector<1x1x128xf32> to vector<1x128xf32>
    %155 = vector.broadcast %154 : vector<1x128xf32> to vector<8x128xf32>
    %156 = arith.mulf %142, %155 : vector<8x128xf32>
    %c2_90 = arith.constant 2 : index
    %c0_91 = arith.constant 0 : index
    %c0_92 = arith.constant 0 : index
    %157 = vector.load %arg9[%c2_90, %c0_91, %c0_92] : memref<9x1x128xf32, #tpu.memory_space<vmem>>, vector<1x1x128xf32>
    %158 = vector.shape_cast %157 : vector<1x1x128xf32> to vector<1x128xf32>
    %159 = vector.broadcast %158 : vector<1x128xf32> to vector<8x128xf32>
    %160 = arith.mulf %143, %159 : vector<8x128xf32>
    %c3_93 = arith.constant 3 : index
    %c0_94 = arith.constant 0 : index
    %c0_95 = arith.constant 0 : index
    %161 = vector.load %arg9[%c3_93, %c0_94, %c0_95] : memref<9x1x128xf32, #tpu.memory_space<vmem>>, vector<1x1x128xf32>
    %162 = vector.shape_cast %161 : vector<1x1x128xf32> to vector<1x128xf32>
    %163 = vector.broadcast %162 : vector<1x128xf32> to vector<8x128xf32>
    %164 = arith.mulf %144, %163 : vector<8x128xf32>
    %c4_96 = arith.constant 4 : index
    %c0_97 = arith.constant 0 : index
    %c0_98 = arith.constant 0 : index
    %165 = vector.load %arg9[%c4_96, %c0_97, %c0_98] : memref<9x1x128xf32, #tpu.memory_space<vmem>>, vector<1x1x128xf32>
    %166 = vector.shape_cast %165 : vector<1x1x128xf32> to vector<1x128xf32>
    %167 = vector.broadcast %166 : vector<1x128xf32> to vector<8x128xf32>
    %168 = arith.mulf %140, %167 : vector<8x128xf32>
    %c5_99 = arith.constant 5 : index
    %c0_100 = arith.constant 0 : index
    %c0_101 = arith.constant 0 : index
    %169 = vector.load %arg9[%c5_99, %c0_100, %c0_101] : memref<9x1x128xf32, #tpu.memory_space<vmem>>, vector<1x1x128xf32>
    %170 = vector.shape_cast %169 : vector<1x1x128xf32> to vector<1x128xf32>
    %171 = vector.broadcast %170 : vector<1x128xf32> to vector<8x128xf32>
    %172 = arith.mulf %145, %171 : vector<8x128xf32>
    %c6_102 = arith.constant 6 : index
    %c0_103 = arith.constant 0 : index
    %c0_104 = arith.constant 0 : index
    %173 = vector.load %arg9[%c6_102, %c0_103, %c0_104] : memref<9x1x128xf32, #tpu.memory_space<vmem>>, vector<1x1x128xf32>
    %174 = vector.shape_cast %173 : vector<1x1x128xf32> to vector<1x128xf32>
    %175 = vector.broadcast %174 : vector<1x128xf32> to vector<8x128xf32>
    %176 = arith.mulf %146, %175 : vector<8x128xf32>
    %c7_105 = arith.constant 7 : index
    %c0_106 = arith.constant 0 : index
    %c0_107 = arith.constant 0 : index
    %177 = vector.load %arg9[%c7_105, %c0_106, %c0_107] : memref<9x1x128xf32, #tpu.memory_space<vmem>>, vector<1x1x128xf32>
    %178 = vector.shape_cast %177 : vector<1x1x128xf32> to vector<1x128xf32>
    %179 = vector.broadcast %178 : vector<1x128xf32> to vector<8x128xf32>
    %180 = arith.mulf %147, %179 : vector<8x128xf32>
    %c8_108 = arith.constant 8 : index
    %c0_109 = arith.constant 0 : index
    %c0_110 = arith.constant 0 : index
    %181 = vector.load %arg9[%c8_108, %c0_109, %c0_110] : memref<9x1x128xf32, #tpu.memory_space<vmem>>, vector<1x1x128xf32>
    %182 = vector.shape_cast %181 : vector<1x1x128xf32> to vector<1x128xf32>
    %183 = vector.broadcast %182 : vector<1x128xf32> to vector<8x128xf32>
    %184 = arith.mulf %148, %183 : vector<8x128xf32>
    %185 = tpu.concatenate %152, %156, %160, %164, %168, %172, %176, %180, %184 in 0 : vector<8x128xf32>, vector<8x128xf32>, vector<8x128xf32>, vector<8x128xf32>, vector<8x128xf32>, vector<8x128xf32>, vector<8x128xf32>, vector<8x128xf32>, vector<8x128xf32> -> vector<72x128xf32>
    %186 = arith.truncf %185 : vector<72x128xf32> to vector<72x128xbf16>
    %c0_111 = arith.constant 0 : index
    %c0_112 = arith.constant 0 : index
    %187 = vector.load %arg7[%c0_111, %c0_112] : memref<8x72xbf16, #tpu.memory_space<vmem>>, vector<8x72xbf16>
    %cst_113 = arith.constant dense<0.000000e+00> : vector<8x128xf32>
    %188 = tpu.matmul %187, %186, %cst_113 {dimension_numbers = #tpu.dot_dimension_numbers<[1], [0], [0], [1], [0, 0, 1, 1], [], []>} : vector<8x72xbf16>, vector<72x128xbf16>, vector<8x128xf32> -> vector<8x128xf32>
    %c0_114 = arith.constant 0 : index
    %c0_115 = arith.constant 0 : index
    %189 = vector.load %arg8[%c0_114, %c0_115] : memref<8x1xf32, #tpu.memory_space<vmem>>, vector<8x1xf32>
    %190 = vector.broadcast %189 : vector<8x1xf32> to vector<8x128xf32>
    %191 = arith.addf %188, %190 : vector<8x128xf32>
    %192 = vector.broadcast %62 : vector<1x128xf32> to vector<8x128xf32>
    %193 = arith.mulf %191, %192 : vector<8x128xf32>
    %194 = vector.shape_cast %193 : vector<8x128xf32> to vector<1x8x128xf32>
    %cst_116 = arith.constant dense<0.000000e+00> : vector<1xf32>
    %195 = vector.multi_reduction <add>, %194, %cst_116 [1, 2] : vector<1x8x128xf32> to vector<1xf32>
    %196 = vector.shape_cast %195 : vector<1xf32> to vector<1x1x1xf32>
    %197 = vector.extract %196[0, 0, 0] : f32 from vector<1x1x1xf32>
    %cst_117 = arith.constant 0.001953125 : f32
    %198 = arith.mulf %197, %cst_117 : f32
    %199 = arith.mulf %193, %193 : vector<8x128xf32>
    %200 = vector.shape_cast %199 : vector<8x128xf32> to vector<1x8x128xf32>
    %cst_118 = arith.constant dense<0.000000e+00> : vector<1xf32>
    %201 = vector.multi_reduction <add>, %200, %cst_118 [1, 2] : vector<1x8x128xf32> to vector<1xf32>
    %202 = vector.shape_cast %201 : vector<1xf32> to vector<1x1x1xf32>
    %203 = vector.extract %202[0, 0, 0] : f32 from vector<1x1x1xf32>
    %cst_119 = arith.constant 0.001953125 : f32
    %204 = arith.mulf %203, %cst_119 : f32
    %205 = arith.mulf %198, %198 : f32
    %206 = arith.subf %204, %205 : f32
    %cst_120 = arith.constant 9.99999974E-6 : f32
    %207 = arith.addf %206, %cst_120 : f32
    %208 = math.rsqrt %207 : f32
    %209 = vector.broadcast %198 : f32 to vector<8x128xf32>
    %210 = arith.subf %193, %209 : vector<8x128xf32>
    %211 = vector.broadcast %208 : f32 to vector<8x128xf32>
    %212 = arith.mulf %210, %211 : vector<8x128xf32>
    %c0_121 = arith.constant 0 : index
    %c0_122 = arith.constant 0 : index
    %213 = vector.load %arg12[%c0_121, %c0_122] : memref<8x128xf32, #tpu.memory_space<vmem>>, vector<8x128xf32>
    %214 = arith.mulf %212, %213 : vector<8x128xf32>
    %c0_123 = arith.constant 0 : index
    %c0_124 = arith.constant 0 : index
    %215 = vector.load %arg13[%c0_123, %c0_124] : memref<8x128xf32, #tpu.memory_space<vmem>>, vector<8x128xf32>
    %216 = arith.addf %214, %215 : vector<8x128xf32>
    %cst_125 = arith.constant 0.000000e+00 : f32
    %217 = vector.broadcast %cst_125 : f32 to vector<8x128xf32>
    %218 = arith.maximumf %216, %217 : vector<8x128xf32>
    %c0_126 = arith.constant 0 : index
    %c0_127 = arith.constant 0 : index
    %c0_128 = arith.constant 0 : index
    %219 = vector.load %arg14[%c0_126, %c0_127, %c0_128] : memref<1x8x128xf32, #tpu.memory_space<vmem>>, vector<1x8x128xf32>
    %220 = vector.shape_cast %219 : vector<1x8x128xf32> to vector<8x128xf32>
    %221 = vector.shape_cast %218 : vector<8x128xf32> to vector<1x8x128xf32>
    tpu.vector_store %arg14[%c0_126, %c0_127, %c0_128], %221 {strides = array<i32>} : memref<1x8x128xf32, #tpu.memory_space<vmem>>, vector<1x8x128xf32>,
    return
  }
  func.func @transform_0(%arg0: i32) -> (i32, i32, i32) {
    %c0_i32 = arith.constant 0 : i32
    %c0_i32_0 = arith.constant 0 : i32
    %c0_i32_1 = arith.constant 0 : i32
    return %arg0, %c0_i32, %c0_i32_0 : i32, i32, i32
  }
  func.func @transform_1(%arg0: i32) -> (i32, i32) {
    %c0_i32 = arith.constant 0 : i32
    %c0_i32_0 = arith.constant 0 : i32
    %c0_i32_1 = arith.constant 0 : i32
    return %c0_i32, %c0_i32_0 : i32, i32
  }
  func.func @transform_2(%arg0: i32) -> (i32, i32) {
    %c0_i32 = arith.constant 0 : i32
    %c0_i32_0 = arith.constant 0 : i32
    %c0_i32_1 = arith.constant 0 : i32
    return %c0_i32, %c0_i32_0 : i32, i32
  }
  func.func @transform_3(%arg0: i32) -> (i32, i32, i32) {
    %c0_i32 = arith.constant 0 : i32
    %c0_i32_0 = arith.constant 0 : i32
    %c0_i32_1 = arith.constant 0 : i32
    %c0_i32_2 = arith.constant 0 : i32
    return %c0_i32, %c0_i32_0, %c0_i32_1 : i32, i32, i32
  }
  func.func @transform_4(%arg0: i32) -> (i32, i32) {
    %c0_i32 = arith.constant 0 : i32
    %c0_i32_0 = arith.constant 0 : i32
    %c0_i32_1 = arith.constant 0 : i32
    return %c0_i32, %c0_i32_0 : i32, i32
  }
  func.func @transform_5(%arg0: i32) -> (i32, i32) {
    %c0_i32 = arith.constant 0 : i32
    %c0_i32_0 = arith.constant 0 : i32
    %c0_i32_1 = arith.constant 0 : i32
    return %c0_i32, %c0_i32_0 : i32, i32
  }
  func.func @transform_6(%arg0: i32) -> (i32, i32) {
    %c0_i32 = arith.constant 0 : i32
    %c0_i32_0 = arith.constant 0 : i32
    %c0_i32_1 = arith.constant 0 : i32
    return %c0_i32, %c0_i32_0 : i32, i32
  }
  func.func @transform_7(%arg0: i32) -> (i32, i32) {
    %c0_i32 = arith.constant 0 : i32
    %c0_i32_0 = arith.constant 0 : i32
    %c0_i32_1 = arith.constant 0 : i32
    return %c0_i32, %c0_i32_0 : i32, i32
  }
  func.func @transform_8(%arg0: i32) -> (i32, i32, i32) {
    %c0_i32 = arith.constant 0 : i32
    %c0_i32_0 = arith.constant 0 : i32
    %c0_i32_1 = arith.constant 0 : i32
    %c0_i32_2 = arith.constant 0 : i32
    return %c0_i32, %c0_i32_0, %c0_i32_1 : i32, i32, i32
  }
  func.func @transform_9(%arg0: i32) -> (i32, i32) {
    %c0_i32 = arith.constant 0 : i32
    %c0_i32_0 = arith.constant 0 : i32
    %c0_i32_1 = arith.constant 0 : i32
    return %c0_i32, %c0_i32_0 : i32, i32
  }
  func.func @transform_10(%arg0: i32) -> (i32, i32) {
    %c0_i32 = arith.constant 0 : i32
    %c0_i32_0 = arith.constant 0 : i32
    %c0_i32_1 = arith.constant 0 : i32
    return %c0_i32, %c0_i32_0 : i32, i32
  }
  func.func @transform_11(%arg0: i32) -> (i32, i32) {
    %c0_i32 = arith.constant 0 : i32
    %c0_i32_0 = arith.constant 0 : i32
    %c0_i32_1 = arith.constant 0 : i32
    return %c0_i32, %c0_i32_0 : i32, i32
  }
  func.func @transform_12(%arg0: i32) -> (i32, i32) {
    %c0_i32 = arith.constant 0 : i32
    %c0_i32_0 = arith.constant 0 : i32
    %c0_i32_1 = arith.constant 0 : i32
    return %c0_i32, %c0_i32_0 : i32, i32
  }
  func.func @transform_13(%arg0: i32) -> (i32, i32, i32) {
    %c0_i32 = arith.constant 0 : i32
    %c0_i32_0 = arith.constant 0 : i32
    %c0_i32_1 = arith.constant 0 : i32
    return %arg0, %c0_i32, %c0_i32_0 : i32, i32, i32
  }
}

</mosaic_0001>

<bundles_post_ra>
// kernel: down_block_forward.1
= control target key start
LH: loop header
LB: loop body
LE: loop exit
PB: predicated region body
PF: predicated region fallthrough
CT: control target
= control target key end

     0   :  { %s1194_s25 = smov 0   ;;  %s1385_s0 = inlined_call_operand.vmem [shape: f32[2,32,128], index: 0, kind: input, shape index: {}]   ;;  %s1386_s1 = inlined_call_operand.vmem [shape: bf16[8,72], index: 1, kind: input, shape index: {}]   ;;  %s1387_s2 = inlined_call_operand.vmem [shape: f32[8,1], index: 2, kind: input, shape index: {}]   ;;  %s1388_s3 = inlined_call_operand.vmem [shape: f32[9,1,128], index: 3, kind: input, shape index: {}]   ;;  %s1389_s4 = inlined_call_operand.vmem [shape: bf16[8,72], index: 4, kind: input, shape index: {}]   ;;  %s1390_s5 = inlined_call_operand.vmem [shape: f32[8,1], index: 5, kind: input, shape index: {}]   ;;  %s1391_s6 = inlined_call_operand.vmem [shape: bf16[8,72], index: 6, kind: input, shape index: {}]   ;;  %s1392_s7 = inlined_call_operand.vmem [shape: f32[8,1], index: 7, kind: input, shape index: {}]   ;;  %s1393_s8 = inlined_call_operand.vmem [shape: f32[9,1,128], index: 8, kind: input, shape index: {}]   ;;  %s1394_s9 = inlined_call_operand.vmem [shape: f32[8,128], index: 9, kind: input, shape index: {}]   ;;  %s1395_s10 = inlined_call_operand.vmem [shape: f32[8,128], index: 10, kind: input, shape index: {}]   ;;  %s1396_s11 = inlined_call_operand.vmem [shape: f32[8,128], index: 11, kind: input, shape index: {}]   ;;  %s1397_s12 = inlined_call_operand.vmem [shape: f32[8,128], index: 12, kind: input, shape index: {}]   ;;  %s1398_s13 = inlined_call_operand.vmem [shape: f32[2,8,128], index: 13, kind: output, shape index: {}]  }
   0x1 LB: > { %s960_s26 = sadd.s32 4294967295, %s1111_s25   ;;  %p964_p0 = scmp.ge.s32.totalorder %s1111_s25, 1  ;;  %s1111_s25 = sphi %s1194_s25, %s23_s25  }
   0x2   : > { %p387_p1 = scmp.lt.s32.totalorder %s1111_s25, 3 }
   0x4   : > { %p388_p2 = pnand %p964_p0, %p387_p1 }
   0x5   : > { %p430_p3 = scmp.lt.s32.totalorder (!%p388_p2), %s960_s26, 1  ;;  %s1400_s20 = smov (!%p388_p2), 1  }
   0x6   : > { %391 = sbr.rel (%p388_p2) target bundleno = 1585 (0x631), region = 72  ;;  %s1399_s21 = smov (!%p388_p2), 8  }
   0x7   : > { %s1402_s22 = smov (!%p388_p2), 9   ;;  %s1120_s30 = smov (!%p388_p2), 119  }
   0x8   : > { %s1401_s14 = smov (!%p388_p2), 127   ;;  %s1122_s15 = smov (!%p388_p2), 120  }
   0x9   : > { %s1123_s16 = smov (!%p388_p2), 7  }
   0xb   : > { %s1408_s26 = smov (!%p430_p3, %s960_s26), 1  ;;  %v1113_v0 = vmov 0.0   ;;  %v976_v1 = vld [vmem:[%s1388_s3 + $0x4] ss:$0 sm:$0xff]  ;;  %v978_v2 = vld [vmem:[%s1388_s3 + $0x5] ss:$0 sm:$0xff] }
   0xc   : > { %1026 = vmatprep.subr.bf16.mxu0 %v1113_v0  ;;  %1040 = vmatprep.subr.bf16.mxu1 %v1113_v0  ;;  %s1007_s29 = sshll.u32 %s1408_s26, 5  ;;  %v984_v3 = vld [vmem:[%s1388_s3 + $0x8] ss:$0 sm:$0xff]  ;;  %vm550_vm0 = vcmask 1043456   ;;  %vm1117_vm1 = vmmov 0   ;;  %v540_v14 = vld [vmem:[%s1387_s2] sm:$0xff] }
   0xd   : > { %s434_s19 = scalar_lea.vmem %s1385_s0, %s1007_s29  ;;  %1036 = vmatprep.mubr.msk.bf16.mxu0 %vm1117_vm1, %v1113_v0  ;;  %1050 = vmatprep.mubr.msk.bf16.mxu1 %vm1117_vm1, %v1113_v0  ;;  %v1118_v15 = vmov 0   ;;  %v982_v16 = vld [vmem:[%s1388_s3 + $0x7] ss:$0 sm:$0xff]  ;;  %v980_v17 = vld [vmem:[%s1388_s3 + $0x6] ss:$0 sm:$0xff]  ;;  %vm546_vm2 = vcmask 588800  }
   0xe   : > { %v443_v4 = vld [vmem:[%s434_s19 + $0x18] sm:$0xff]  ;;  %v441_v5 = vld [vmem:[%s434_s19 + $0x8] sm:$0xff]  ;;  %v440_v6 = vld [vmem:[%s434_s19] sm:$0xff]  ;;  %1099 = vset.pattern.permute.xlu1 %v1118_v15  ;;  %1100 = vset.pattern.permute.xlu0 %v1118_v15  ;;  %s1119_s29 = smov 121  }
   0xf   : > { %452 = vrot.lane.b32.xlu0 %v443_v4, %s1400_s20  ;;  %450 = vrot.lane.b32.xlu1 %v441_v5, %s1400_s20  ;;  %v497_v7 = vmul.f32 %v976_v1, %v440_v6  ;;  %v506_v8 = vmul.f32 %v978_v2, %v441_v5  ;;  %v533_v9 = vmul.f32 %v984_v3, %v443_v4  ;;  %v442_v13 = vld [vmem:[%s434_s19 + $0x10] sm:$0xff]  ;;  %v972_v22 = vld [vmem:[%s1388_s3 + $0x2] ss:$0 sm:$0xff] }
  0x10   : > { %v524_v18 = vmul.f32 %v982_v16, %v442_v13  ;;  %v974_v23 = vld [vmem:[%s1388_s3 + $0x3] ss:$0 sm:$0xff]  ;;  %v970_v28 = vld [vmem:[%s1388_s3 + $0x1] ss:$0 sm:$0xff]  ;;  %v968_v29 = vld [vmem:[%s1388_s3] ss:$0 sm:$0xff] }
  0x11   : > { %v536_v10 = vpack.c.bf16 %v506_v8, %v497_v7  ;;  %v538_v11 = vpack.c.bf16 %v533_v9, %v533_v9  ;;  %v539_v36 = vld [vmem:[%s1386_s1] sm:$0xf]  ;;  %v1275_v45 = vld [vmem:[%s1393_s8 + $0x8] ss:$0 sm:$0xff]  ;;  %v1281_v49 = vld [vmem:[%s1393_s8 + $0x6] ss:$0 sm:$0xff] }
  0x12   : > { %v697_v44 = vld [vmem:[%s1390_s5] sm:$0xff] }
  0x13   : > { %448 = vrot.lane.b32.xlu0 %v443_v4, %s1399_s21  ;;  %444 = vrot.lane.b32.xlu1 %v443_v4, %s1402_s22  ;;  %v552_v12 = vsel %vm550_vm0, %v538_v11, 0  ;;  %v1286_v50 = vld [vmem:[%s1393_s8 + $0x7] ss:$0 sm:$0xff]  ;;  %v1292_v55 = vld [vmem:[%s1393_s8 + $0x5] ss:$0 sm:$0xff] }
  0x14   : > { %1027 = vmatpush3.bf16.msra.mxu0 %v552_v12  ;;  %v1299_v58 = vld [vmem:[%s1393_s8 + $0x4] ss:$0 sm:$0xff]  ;;  %v1306_v63 = vld [vmem:[%s1393_s8 + $0x3] ss:$0 sm:$0xff]  ;;  %v1311_v1 = vld [vmem:[%s1393_s8 + $0x2] ss:$0 sm:$0xff] }
  0x15   : > { %1028 = vmatprep.subr.bf16.mxu0 %v1113_v0  ;;  %v1320_v6 = vld [vmem:[%s1393_s8 + $0x1] ss:$0 sm:$0xff]  ;;  %v1325_v8 = vld [vmem:[%s1393_s8] ss:$0 sm:$0xff] }
  0x17   : > { %446 = vrot.lane.b32.xlu0 %v442_v13, %s1399_s21  ;;  %543 = vperm.xlu1 %1099, %v540_v14   ;;  %v696_v14 = vld [vmem:[%s1389_s4] sm:$0xf] }
  0x81   : > { %v453_v19 = vpop.permute.xlu0 %452  ;;  %v451_v20 = vpop.permute.xlu1 %450 }
  0x82   : > { %v515_v21 = vmul.f32 %v980_v17, %v453_v19  ;;  %v488_v27 = vmul.f32 %v974_v23, %v451_v20 }
  0x84   : > { %v537_v24 = vpack.c.bf16 %v524_v18, %v515_v21 }
  0x85   : > { %v449_v25 = vpop.permute.xlu0 %448  ;;  %v445_v30 = vpop.permute.xlu1 %444 }
  0x86   : > { %1029 = vmatpush3.bf16.msra.mxu0 %v537_v24  ;;  %v479_v26 = vmul.f32 %v972_v22, %v449_v25  ;;  %v461_v34 = vmul.f32 %v968_v29, %v445_v30 }
  0x87   : > { %1030 = vmatprep.subr.bf16.mxu0 %v1113_v0 }
  0x88   : > { %v535_v32 = vpack.c.bf16 %v488_v27, %v479_v26 }
  0x89   : > { %v447_v31 = vpop.permute.xlu0 %446 }
  0x8a   : > { %1031 = vmatpush3.bf16.msra.mxu0 %v536_v10  ;;  %v470_v33 = vmul.f32 %v970_v28, %v447_v31 }
  0x8b   : > { %1032 = vmatprep.subr.bf16.mxu0 %v1113_v0 }
  0x8c   : > { %v534_v35 = vpack.c.bf16 %v470_v33, %v461_v34 }
  0x8e   : > { %1033 = vmatpush3.bf16.msra.mxu0 %v535_v32 }
  0x8f   : > { %1034 = vmatprep.subr.bf16.mxu0 %v1113_v0 }
  0x92   : > { %1035 = vmatpush3.bf16.msra.mxu0 %v534_v35  ;;  %v544_v37 = vpop.permute.xlu1 %543 }
  0x93   : > { %1054 = vmatprep.subr.bf16.mxu0 %v1113_v0 }
  0x95   : > { %1037 = vmatmul.mubr.msk.bf16.vlgmr.msra.gmra.mxu0 %vm546_vm2, %v539_v36 }
  0x96   : > { %1064 = vmatprep.mubr.msk.bf16.mxu0 %vm1117_vm1, %v1113_v0 }
 0x155   : > { %v588_v38 = vpop.f32.mrf.mxu0 }
 0x156   : > { %v589_v39 = vadd.f32 %v588_v38, %v544_v37 }
 0x157   : > { %v1038_v40 = vpop.f32.mrf.mxu0 }
 0x158   : > { %v594_v41 = vmax.f32 %v589_v39, 0.0 }
 0x159   : > { %v591_v42 = vpop.f32.mrf.mxu0 }
 0x15a   : > { %607 = vrot.lane.b32.xlu1 %v594_v41, %s1119_s29  ;;  %611 = vrot.lane.b32.xlu0 %v594_v41, %s1120_s30  ;;  %v654_v2 = vmul.f32 %v1299_v58, %v594_v41  ;;  %v781_v42 = vld [vmem:[%s1394_s9] sm:$0xff] }
 0x15b   : > { %v1039_v43 = vpop.f32.mrf.mxu0 }
 0x15e   : > { %605 = vrot.lane.b32.xlu1 %v594_v41, %s1401_s14  ;;  %609 = vrot.lane.b32.xlu0 %v594_v41, %s1122_s15 }
 0x162   : > { %603 = vrot.lane.b32.xlu1 %v594_v41, %s1400_s20  ;;  %601 = vrot.lane.b32.xlu0 %v594_v41, %s1123_s16  ;;  %s1404_s20 = smov 127  }
 0x166   : > { %599 = vrot.lane.b32.xlu1 %v594_v41, %s1399_s21  ;;  %597 = vrot.lane.b32.xlu0 %v594_v41, %s1402_s22  ;;  %s1405_s22 = smov 1  }
 0x16a   : > { %700 = vperm.xlu0 %1100, %v697_v44   ;;  %v783_v44 = vld [vmem:[%s1395_s10] sm:$0xff] }
 0x1cc   : > { %v608_v46 = vpop.permute.xlu1 %607  ;;  %v612_v47 = vpop.permute.xlu0 %611 }
 0x1cd   : > { %v690_v48 = vmul.f32 %v1275_v45, %v612_v47  ;;  %v672_v54 = vmul.f32 %v1281_v49, %v608_v46 }
 0x1cf   : > { %v695_v51 = vpack.c.bf16 %v690_v48, %v690_v48 }
 0x1d0   : > { %v606_v52 = vpop.permute.xlu1 %605  ;;  %v610_v53 = vpop.permute.xlu0 %609 }
 0x1d1   : > { %v681_v56 = vmul.f32 %v1286_v50, %v610_v53  ;;  %v707_v57 = vsel %vm550_vm0, %v695_v51, 0  ;;  %v663_v60 = vmul.f32 %v1292_v55, %v606_v52  ;;  %v817_v51 = vld [vmem:[%s1392_s7] sm:$0xff] }
 0x1d2   : > { %1041 = vmatpush3.bf16.msra.mxu1 %v707_v57 }
 0x1d3   : > { %v694_v59 = vpack.c.bf16 %v681_v56, %v672_v54  ;;  %1042 = vmatprep.subr.bf16.mxu1 %v1113_v0  ;;  %v693_v3 = vpack.c.bf16 %v663_v60, %v654_v2 }
 0x1d4   : > { %v604_v61 = vpop.permute.xlu1 %603  ;;  %v602_v62 = vpop.permute.xlu0 %601 }
 0x1d5   : > { %v647_v4 = vmul.f32 %v1306_v63, %v604_v61  ;;  %v638_v5 = vmul.f32 %v1311_v1, %v602_v62 }
 0x1d6   : > { %1043 = vmatpush3.bf16.msra.mxu1 %v694_v59 }
 0x1d7   : > { %1044 = vmatprep.subr.bf16.mxu1 %v1113_v0  ;;  %v692_v10 = vpack.c.bf16 %v647_v4, %v638_v5 }
 0x1d8   : > { %v600_v7 = vpop.permute.xlu1 %599  ;;  %v598_v9 = vpop.permute.xlu0 %597 }
 0x1d9   : > { %v629_v11 = vmul.f32 %v1320_v6, %v600_v7  ;;  %v620_v12 = vmul.f32 %v1325_v8, %v598_v9 }
 0x1da   : > { %1045 = vmatpush3.bf16.msra.mxu1 %v693_v3 }
 0x1db   : > { %1046 = vmatprep.subr.bf16.mxu1 %v1113_v0  ;;  %v691_v13 = vpack.c.bf16 %v629_v11, %v620_v12 }
 0x1de   : > { %1047 = vmatpush3.bf16.msra.mxu1 %v692_v10 }
 0x1df   : > { %1048 = vmatprep.subr.bf16.mxu1 %v1113_v0 }
 0x1e2   : > { %1049 = vmatpush3.bf16.msra.mxu1 %v691_v13 }
 0x1e5   : > { %1051 = vmatmul.mubr.msk.bf16.vlgmr.msra.gmra.mxu1 %vm546_vm2, %v696_v14  ;;  %v701_v15 = vpop.permute.xlu0 %700 }
 0x2a5   : > { %v743_v16 = vpop.f32.mrf.mxu1 }
 0x2a6   : > { %v744_v17 = vadd.f32 %v743_v16, %v701_v15 }
 0x2a7   : > { %v1052_v18 = vpop.f32.mrf.mxu1 }
 0x2a8   : > { %v749_v19 = vmul.f32 %v1299_v58, %v744_v17 }
 0x2a9   : > { %v746_v20 = vpop.f32.mrf.mxu1 }
 0x2aa   : > { %750 = vadd.xlane.f32.xlu1 %v749_v19  ;;  %v760_v21 = vmul.f32 %v749_v19, %v749_v19 }
 0x2ab   : > { %v1053_v22 = vpop.f32.mrf.mxu1 }
 0x2ac   : > { %761 = vadd.xlane.f32.xlu0 %v760_v21 }
 0x333   : > { %v751_v23 = vpop.xlane.xlu1 %750 }
 0x334   : > { %v752_v24 = vrot.slane %v751_v23, 4 }
 0x335   : > { %v762_v25 = vpop.xlane.xlu0 %761 }
 0x336   : > { %v753_v26 = vadd.f32 %v752_v24, %v751_v23  ;;  %v763_v27 = vrot.slane %v762_v25, 4 }
 0x338   : > { %v754_v28 = vrot.slane %v753_v26, 2  ;;  %v764_v29 = vadd.f32 %v763_v27, %v762_v25 }
 0x33a   : > { %v765_v30 = vrot.slane %v764_v29, 2  ;;  %v755_v31 = vadd.f32 %v754_v28, %v753_v26 }
 0x33c   : > { %v756_v32 = vrot.slane %v755_v31, 1  ;;  %v766_v33 = vadd.f32 %v765_v30, %v764_v29 }
 0x33e   : > { %v757_v34 = vadd.f32 %v756_v32, %v755_v31  ;;  %v767_v35 = vrot.slane %v766_v33, 1 }
 0x340   : > { %1068 = vpush %v757_v34  ;;  %v768_v36 = vadd.f32 %v767_v35, %v766_v33 }
 0x342   : > { %1070 = vpush %v768_v36  ;;  %v901_v36 = vld [vmem:[%s1396_s11] sm:$0xff] }
 0x371   : > { %s1069_s27 = spop %1068 }
 0x372   : > { %s759_s28 = smul.f32 0.001953125, %s1069_s27 }
 0x373   : > { %s1071_s17 = spop %1070 }
 0x374   : > { %s771_s18 = smul.f32 %s759_s28, %s759_s28  ;;  %v777_v39 = vstv %s759_s28  ;;  %s1403_s28 = smov 9  }
 0x375   : > { %s770_s19 = smul.f32 0.001953125, %s1071_s17  ;;  %v778_v40 = vsub.f32 %v749_v19, %v777_v39 }
 0x377   : > { %s772_s23 = ssub.f32 %s770_s19, %s771_s18  ;;  %s1406_s18 = smov 8  }
 0x379   : > { %s773_s21 = sadd.f32 1e-05, %s772_s23 }
 0x37b   : > { %v774_v37 = vstv %s773_s21 }
 0x37c   : > { %1101 = vrsqrt.f32 %v774_v37 }
 0x389   : > { %v1102_v38 = vpop.eup %1101 }
 0x38a   : > { %1072 = vpush %v1102_v38  ;;  %v903_v38 = vld [vmem:[%s1397_s12] sm:$0xff] }
 0x3bb   : > { %s1073_s24 = spop %1072 }
 0x3bc   : > { %v779_v41 = vstv %s1073_s24 }
 0x3bd   : > { %v780_v43 = vmul.f32 %v779_v41, %v778_v40 }
 0x3bf   : > { %v782_v46 = vmul.f32 %v781_v42, %v780_v43 }
 0x3c1   : > { %v784_v47 = vadd.f32 %v783_v44, %v782_v46 }
 0x3c3   : > { %v785_v48 = vmax.f32 %v784_v47, 0.0 }
 0x3c5   : > { %796 = vrot.lane.b32.xlu0 %v785_v48, %s1119_s29  ;;  %800 = vrot.lane.b32.xlu1 %v785_v48, %s1120_s30  ;;  %v806_v4 = vmul.f32 %v1299_v58, %v785_v48 }
 0x3c9   : > { %790 = vrot.lane.b32.xlu0 %v785_v48, %s1123_s16  ;;  %798 = vrot.lane.b32.xlu1 %v785_v48, %s1122_s15 }
 0x3cd   : > { %786 = vrot.lane.b32.xlu0 %v785_v48, %s1403_s28  ;;  %794 = vrot.lane.b32.xlu1 %v785_v48, %s1404_s20 }
 0x3d1   : > { %820 = vperm.xlu0 %1100, %v817_v51   ;;  %792 = vrot.lane.b32.xlu1 %v785_v48, %s1405_s22 }
 0x3d5   : > { %788 = vrot.lane.b32.xlu1 %v785_v48, %s1406_s18  ;;  %s967_s18 = sshll.u32 %s1408_s26, 3 }
 0x437   : > { %v801_v52 = vpop.permute.xlu1 %800  ;;  %v797_v54 = vpop.permute.xlu0 %796 }
 0x438   : > { %v810_v53 = vmul.f32 %v1275_v45, %v801_v52  ;;  %v808_v59 = vmul.f32 %v1281_v49, %v797_v54 }
 0x43a   : > { %v815_v56 = vpack.c.bf16 %v810_v53, %v810_v53 }
 0x43b   : > { %v799_v57 = vpop.permute.xlu1 %798  ;;  %v791_v2 = vpop.permute.xlu0 %790 }
 0x43c   : > { %v827_v60 = vsel %vm550_vm0, %v815_v56, 0  ;;  %v809_v61 = vmul.f32 %v1286_v50, %v799_v57  ;;  %v804_v49 = vmul.f32 %v1311_v1, %v791_v2  ;;  %v816_v1 = vld [vmem:[%s1391_s6] sm:$0xf] }
 0x43d   : > { %1055 = vmatpush3.bf16.msra.mxu0 %v827_v60 }
 0x43e   : > { %v814_v62 = vpack.c.bf16 %v809_v61, %v808_v59  ;;  %1056 = vmatprep.subr.bf16.mxu0 %v1113_v0 }
 0x43f   : > { %v795_v3 = vpop.permute.xlu1 %794  ;;  %v787_v50 = vpop.permute.xlu0 %786 }
 0x440   : > { %v807_v5 = vmul.f32 %v1292_v55, %v795_v3  ;;  %v802_v12 = vmul.f32 %v1325_v8, %v787_v50 }
 0x441   : > { %1057 = vmatpush3.bf16.msra.mxu0 %v814_v62 }
 0x442   : > { %v813_v45 = vpack.c.bf16 %v807_v5, %v806_v4  ;;  %1058 = vmatprep.subr.bf16.mxu0 %v1113_v0 }
 0x443   : > { %v793_v7 = vpop.permute.xlu1 %792 }
 0x444   : > { %v805_v9 = vmul.f32 %v1306_v63, %v793_v7 }
 0x445   : > { %1059 = vmatpush3.bf16.msra.mxu0 %v813_v45 }
 0x446   : > { %v812_v10 = vpack.c.bf16 %v805_v9, %v804_v49  ;;  %1060 = vmatprep.subr.bf16.mxu0 %v1113_v0 }
 0x447   : > { %v789_v11 = vpop.permute.xlu1 %788 }
 0x448   : > { %v803_v13 = vmul.f32 %v1320_v6, %v789_v11 }
 0x449   : > { %1061 = vmatpush3.bf16.msra.mxu0 %v812_v10 }
 0x44a   : > { %v811_v55 = vpack.c.bf16 %v803_v13, %v802_v12  ;;  %1062 = vmatprep.subr.bf16.mxu0 %v1113_v0 }
 0x44c   : > { %v821_v63 = vpop.permute.xlu0 %820 }
 0x44d   : > { %1063 = vmatpush3.bf16.msra.mxu0 %v811_v55 }
 0x450   : > { %1065 = vmatmul.mubr.msk.bf16.vlgmr.msra.gmra.mxu0 %vm546_vm2, %v816_v1 }
 0x510   : > { %v863_v14 = vpop.f32.mrf.mxu0 }
 0x511   : > { %v864_v15 = vadd.f32 %v863_v14, %v821_v63 }
 0x512   : > { %v1066_v16 = vpop.f32.mrf.mxu0 }
 0x513   : > { %v869_v17 = vmul.f32 %v1299_v58, %v864_v15 }
 0x514   : > { %v866_v8 = vpop.f32.mrf.mxu0 }
 0x515   : > { %870 = vadd.xlane.f32.xlu1 %v869_v17  ;;  %v880_v6 = vmul.f32 %v869_v17, %v869_v17 }
 0x516   : > { %v1067_v18 = vpop.f32.mrf.mxu0 }
 0x517   : > { %881 = vadd.xlane.f32.xlu0 %v880_v6 }
 0x59e   : > { %v871_v19 = vpop.xlane.xlu1 %870 }
 0x59f   : > { %v872_v0 = vrot.slane %v871_v19, 4 }
 0x5a0   : > { %v882_v20 = vpop.xlane.xlu0 %881 }
 0x5a1   : > { %v873_v21 = vadd.f32 %v872_v0, %v871_v19  ;;  %v883_v22 = vrot.slane %v882_v20, 4 }
 0x5a3   : > { %v874_v23 = vrot.slane %v873_v21, 2  ;;  %v884_v24 = vadd.f32 %v883_v22, %v882_v20 }
 0x5a5   : > { %v875_v25 = vadd.f32 %v874_v23, %v873_v21  ;;  %v885_v26 = vrot.slane %v884_v24, 2 }
 0x5a7   : > { %v886_v27 = vadd.f32 %v885_v26, %v884_v24  ;;  %v876_v28 = vrot.slane %v875_v25, 1 }
 0x5a9   : > { %v877_v29 = vadd.f32 %v876_v28, %v875_v25  ;;  %v887_v30 = vrot.slane %v886_v27, 1 }
 0x5ab   : > { %1074 = vpush %v877_v29  ;;  %v888_v58 = vadd.f32 %v887_v30, %v886_v27 }
 0x5ad   : > { %1076 = vpush %v888_v58 }
 0x5dc   : > { %s1075_s15 = spop %1074 }
 0x5dd   : > { %s879_s16 = smul.f32 0.001953125, %s1075_s15  ;;  %s438_s15 = scalar_lea.vmem %s1398_s13, %s967_s18 }
 0x5de   : > { %s1077_s19 = spop %1076 }
 0x5df   : > { %s891_s23 = smul.f32 %s879_s16, %s879_s16  ;;  %v897_v33 = vstv %s879_s16 }
 0x5e0   : > { %s890_s21 = smul.f32 0.001953125, %s1077_s19  ;;  %v898_v34 = vsub.f32 %v869_v17, %v897_v33 }
 0x5e2   : > { %s892_s24 = ssub.f32 %s890_s21, %s891_s23 }
 0x5e4   : > { %s893_s27 = sadd.f32 1e-05, %s892_s24 }
 0x5e6   : > { %v894_v31 = vstv %s893_s27 }
 0x5e7   : > { %1103 = vrsqrt.f32 %v894_v31 }
 0x5f4   : > { %v1104_v32 = vpop.eup %1103 }
 0x5f5   : > { %1078 = vpush %v1104_v32 }
 0x626   : > { %s1079_s28 = spop %1078 }
 0x627   : > { %v899_v35 = vstv %s1079_s28 }
 0x628   : > { %v900_v37 = vmul.f32 %v899_v35, %v898_v34 }
 0x62a   : > { %v902_v39 = vmul.f32 %v901_v36, %v900_v37 }
 0x62c   : > { %v904_v40 = vadd.f32 %v903_v38, %v902_v39 }
 0x62e   : > { %v905_v41 = vmax.f32 %v904_v40, 0.0 }
 0x630   : > { %906 = vst [vmem:[%s438_s15] sm:$0xff] %v905_v41 }
 0x631 PF: > { %s23_s25 = sadd.s32 1, %s1111_s25  }
 0x632   : > { %p20_p4 = scmp.ge.s32.totalorder %s23_s25, 4  }
 0x634   :  { %22 = sbr.rel (!%p20_p4) target bundleno = 1 (0x1), region = 118 }

</bundles_post_ra>
